<compile_context>
chip_gen: v7x
topology: tpu7x:2x2x1
jax: 0.10.0
libtpu: 0.0.40
codegen_flags: <defaults>
</compile_context>

<pallas_src>
import jax
import jax.numpy as jnp
from jax.experimental import pallas as pl
from jax.experimental.pallas import tpu as pltpu

LANE = 128
SUBLANE = 8


def mlp_deep_kernel(x_ref,
                    w1_ref, b1_ref,
                    w2_ref, b2_ref,
                    w3_ref, b3_ref,
                    w4_ref, b4_ref,
                    o_ref):
    """Whole-network forward for one batch tile.

    x_ref / w*_ref are bf16 (MXU-native); accumulation, bias add and ReLU are
    f32; output tile is f32 with a lane-padded (128) class dimension.
    """
    h = jnp.dot(x_ref[...], w1_ref[...], preferred_element_type=jnp.float32)
    h = jnp.maximum(h + b1_ref[...], 0.0)

    h = jnp.dot(h.astype(jnp.bfloat16), w2_ref[...],
                preferred_element_type=jnp.float32)
    h = jnp.maximum(h + b2_ref[...], 0.0)

    h = jnp.dot(h.astype(jnp.bfloat16), w3_ref[...],
                preferred_element_type=jnp.float32)
    h = jnp.maximum(h + b3_ref[...], 0.0)

    h = jnp.dot(h.astype(jnp.bfloat16), w4_ref[...],
                preferred_element_type=jnp.float32)
    o_ref[...] = (h + b4_ref[...]).astype(o_ref.dtype)


def mlp_classifier_deep_forward(x, params, *, tile_b=256):
    """x: (b, 3, H, W) float32; params: list of 4 (W, b) with W in (in, out)."""
    b = x.shape[0]
    x2d = x.reshape(b, -1)                       # matches torch nn.Flatten on NCHW
    input_dim = x2d.shape[1]
    (w1, b1), (w2, b2), (w3, b3), (w4, b4) = params
    hidden = w1.shape[1]
    num_classes = w4.shape[1]

    # ---- lane-dense padded class dimension (avoid masked vst.msk stores) ----
    n_pad = ((num_classes + LANE - 1) // LANE) * LANE

    # ---- batch tiling: TILE_B multiple of 8, pad batch up to a multiple -----
    tile_b = max(SUBLANE, min(tile_b, ((b + SUBLANE - 1) // SUBLANE) * SUBLANE))
    tile_b = ((tile_b + SUBLANE - 1) // SUBLANE) * SUBLANE
    b_pad = ((b + tile_b - 1) // tile_b) * tile_b
    if b_pad != b:
        x2d = jnp.pad(x2d, ((0, b_pad - b), (0, 0)))

    # ---- bf16 matmul operands; f32 biases; zero-pad last layer to n_pad -----
    x_bf = x2d.astype(jnp.bfloat16)
    w1b = w1.astype(jnp.bfloat16)
    w2b = w2.astype(jnp.bfloat16)
    w3b = w3.astype(jnp.bfloat16)
    w4b = jnp.zeros((hidden, n_pad), jnp.bfloat16).at[:, :num_classes].set(
        w4.astype(jnp.bfloat16))
    b1f = b1.astype(jnp.float32)
    b2f = b2.astype(jnp.float32)
    b3f = b3.astype(jnp.float32)
    b4p = jnp.zeros((1, n_pad), jnp.float32).at[:, :num_classes].set(
        b4.astype(jnp.float32))

    grid = (b_pad // tile_b,)
    batched = lambda i: (i, 0)       # activation stream: new tile each step
    resident = lambda i: (0, 0)      # weights/biases: same block -> VMEM resident

    flops = 2 * b_pad * (input_dim * hidden + 2 * hidden * hidden + hidden * n_pad)
    bytes_accessed = (x_bf.size * 2
                      + (w1b.size + w2b.size + w3b.size + w4b.size) * 2
                      + (b1f.size + b2f.size + b3f.size + b4p.size) * 4
                      + b_pad * n_pad * 4)

    out_padded = pl.pallas_call(
        mlp_deep_kernel,
        out_shape=jax.ShapeDtypeStruct((b_pad, n_pad), jnp.float32),
        grid=grid,
        in_specs=[
            pl.BlockSpec((tile_b, input_dim), batched),
            pl.BlockSpec(w1b.shape, resident),
            pl.BlockSpec(b1f.shape, resident),
            pl.BlockSpec(w2b.shape, resident),
            pl.BlockSpec(b2f.shape, resident),
            pl.BlockSpec(w3b.shape, resident),
            pl.BlockSpec(b3f.shape, resident),
            pl.BlockSpec(w4b.shape, resident),
            pl.BlockSpec(b4p.shape, resident),
        ],
        out_specs=pl.BlockSpec((tile_b, n_pad), batched),
        compiler_params=pltpu.CompilerParams(
            dimension_semantics=("parallel",),        # megacore on v7x
            vmem_limit_bytes=32 * 1024 * 1024,        # safe on v5e/v6e/v7x
        ),
        cost_estimate=pl.CostEstimate(
            flops=flops, transcendentals=0, bytes_accessed=bytes_accessed),
    )(x_bf, w1b, b1f, w2b, b2f, w3b, b3f, w4b, b4p)

    return out_padded[:b, :num_classes]


def init_params(key, input_dim, hidden_dim, num_classes, num_layers=4):
    """Deterministic synthetic init (same layer shapes as the PyTorch module)."""
    assert num_layers >= 4
    dims = [input_dim] + [hidden_dim] * (num_layers - 1) + [num_classes]
    params = []
    for i in range(num_layers):
        key, kw, kb = jax.random.split(key, 3)
        fan_in, fan_out = dims[i], dims[i + 1]
        scale = 1.0 / jnp.sqrt(jnp.float32(fan_in))
        w = jax.random.uniform(kw, (fan_in, fan_out), jnp.float32, -scale, scale)
        bias = jax.random.uniform(kb, (1, fan_out), jnp.float32, -scale, scale)
        params.append((w, bias))
    return params


def reference_forward(x, params):
    """Pure-JAX f32 reference (matches the PyTorch forward)."""
    b = x.shape[0]
    h = x.reshape(b, -1)
    for i, (w, bias) in enumerate(params):
        h = h @ w + bias
        if i != len(params) - 1:
            h = jnp.maximum(h, 0.0)
    return h


if __name__ == "__main__":
    # Small shapes consistent with the module: batch=2, 3 channels, 16x16 image,
    # hidden_dim=32, num_classes=6, num_layers=4.
    B, C, H, W = 2, 3, 16, 16
    HIDDEN, NUM_CLASSES, NUM_LAYERS = 32, 6, 4
    INPUT_DIM = C * H * W

    key = jax.random.PRNGKey(0)
    key, kx = jax.random.split(key)
    x = jax.random.normal(kx, (B, C, H, W), jnp.float32)
    params = init_params(key, INPUT_DIM, HIDDEN, NUM_CLASSES, NUM_LAYERS)

    logits = mlp_classifier_deep_forward(x, params)
    logits = jax.block_until_ready(logits)
    ref = reference_forward(x, params)
    assert logits.shape == (B, NUM_CLASSES)
    # bf16 matmul operands + f32 accumulation -> loosened tolerance vs f32 ref.
    assert jnp.allclose(logits, ref, atol=2e-2, rtol=2e-2), "mismatch vs reference"

    # Second check: non-multiple-of-8 batch with a multi-step batch grid
    # (exercises batch padding + resident-weight pipelining).
    B2 = 19
    key, kx2 = jax.random.split(key)
    x2 = jax.random.normal(kx2, (B2, C, H, W), jnp.float32)
    logits2 = mlp_classifier_deep_forward(x2, params, tile_b=8)
    logits2 = jax.block_until_ready(logits2)
    ref2 = reference_forward(x2, params)
    assert logits2.shape == (B2, NUM_CLASSES)
    assert jnp.allclose(logits2, ref2, atol=2e-2, rtol=2e-2), "mismatch (tiled batch)"

    print("KERNEL_OK")
</pallas_src>

<mosaic_0001>
module attributes {stable_mosaic.version = 11 : i64} {
  func.func @mlp_deep_kernel(%arg0: i32, %arg1: memref<8x768xbf16, #tpu.memory_space<vmem>>, %arg2: memref<768x32xbf16, #tpu.memory_space<vmem>>, %arg3: memref<1x32xf32, #tpu.memory_space<vmem>>, %arg4: memref<32x32xbf16, #tpu.memory_space<vmem>>, %arg5: memref<1x32xf32, #tpu.memory_space<vmem>>, %arg6: memref<32x32xbf16, #tpu.memory_space<vmem>>, %arg7: memref<1x32xf32, #tpu.memory_space<vmem>>, %arg8: memref<32x128xbf16, #tpu.memory_space<vmem>>, %arg9: memref<1x128xf32, #tpu.memory_space<vmem>>, %arg10: memref<8x128xf32, #tpu.memory_space<vmem>>) attributes {dimension_semantics = [#tpu.dimension_semantics<parallel>], iteration_bounds = array<i64: 1>, scalar_prefetch = 0 : i64, scratch_operands = 0 : i64, tpu.core_type = #tpu.core_type<tc>, window_params = [{transform_indices = @transform_0, window_bounds = array<i64: 8, 768>}, {pipeline_mode = #tpu.pipeline_mode<synchronous>, transform_indices = @transform_1, window_bounds = array<i64: 768, 32>}, {pipeline_mode = #tpu.pipeline_mode<synchronous>, transform_indices = @transform_2, window_bounds = array<i64: 1, 32>}, {pipeline_mode = #tpu.pipeline_mode<synchronous>, transform_indices = @transform_3, window_bounds = array<i64: 32, 32>}, {pipeline_mode = #tpu.pipeline_mode<synchronous>, transform_indices = @transform_4, window_bounds = array<i64: 1, 32>}, {pipeline_mode = #tpu.pipeline_mode<synchronous>, transform_indices = @transform_5, window_bounds = array<i64: 32, 32>}, {pipeline_mode = #tpu.pipeline_mode<synchronous>, transform_indices = @transform_6, window_bounds = array<i64: 1, 32>}, {pipeline_mode = #tpu.pipeline_mode<synchronous>, transform_indices = @transform_7, window_bounds = array<i64: 32, 128>}, {pipeline_mode = #tpu.pipeline_mode<synchronous>, transform_indices = @transform_8, window_bounds = array<i64: 1, 128>}, {transform_indices = @transform_9, window_bounds = array<i64: 8, 128>}]} {
    %c0 = arith.constant 0 : index
    %c0_0 = arith.constant 0 : index
    %0 = vector.load %arg1[%c0, %c0_0] : memref<8x768xbf16, #tpu.memory_space<vmem>>, vector<8x768xbf16>
    %c0_1 = arith.constant 0 : index
    %c0_2 = arith.constant 0 : index
    %1 = vector.load %arg2[%c0_1, %c0_2] : memref<768x32xbf16, #tpu.memory_space<vmem>>, vector<768x32xbf16>
    %cst = arith.constant dense<0.000000e+00> : vector<8x32xf32>
    %2 = tpu.matmul %0, %1, %cst {dimension_numbers = #tpu.dot_dimension_numbers<[1], [0], [0], [1], [0, 0, 1, 1], [], []>} : vector<8x768xbf16>, vector<768x32xbf16>, vector<8x32xf32> -> vector<8x32xf32>
    %c0_3 = arith.constant 0 : index
    %c0_4 = arith.constant 0 : index
    %3 = vector.load %arg3[%c0_3, %c0_4] : memref<1x32xf32, #tpu.memory_space<vmem>>, vector<1x32xf32>
    %4 = vector.broadcast %3 : vector<1x32xf32> to vector<8x32xf32>
    %5 = arith.addf %2, %4 : vector<8x32xf32>
    %cst_5 = arith.constant 0.000000e+00 : f32
    %6 = vector.broadcast %cst_5 : f32 to vector<8x32xf32>
    %7 = arith.maximumf %5, %6 : vector<8x32xf32>
    %8 = arith.truncf %7 : vector<8x32xf32> to vector<8x32xbf16>
    %c0_6 = arith.constant 0 : index
    %c0_7 = arith.constant 0 : index
    %9 = vector.load %arg4[%c0_6, %c0_7] : memref<32x32xbf16, #tpu.memory_space<vmem>>, vector<32x32xbf16>
    %cst_8 = arith.constant dense<0.000000e+00> : vector<8x32xf32>
    %10 = tpu.matmul %8, %9, %cst_8 {dimension_numbers = #tpu.dot_dimension_numbers<[1], [0], [0], [1], [0, 0, 1, 1], [], []>} : vector<8x32xbf16>, vector<32x32xbf16>, vector<8x32xf32> -> vector<8x32xf32>
    %c0_9 = arith.constant 0 : index
    %c0_10 = arith.constant 0 : index
    %11 = vector.load %arg5[%c0_9, %c0_10] : memref<1x32xf32, #tpu.memory_space<vmem>>, vector<1x32xf32>
    %12 = vector.broadcast %11 : vector<1x32xf32> to vector<8x32xf32>
    %13 = arith.addf %10, %12 : vector<8x32xf32>
    %cst_11 = arith.constant 0.000000e+00 : f32
    %14 = vector.broadcast %cst_11 : f32 to vector<8x32xf32>
    %15 = arith.maximumf %13, %14 : vector<8x32xf32>
    %16 = arith.truncf %15 : vector<8x32xf32> to vector<8x32xbf16>
    %c0_12 = arith.constant 0 : index
    %c0_13 = arith.constant 0 : index
    %17 = vector.load %arg6[%c0_12, %c0_13] : memref<32x32xbf16, #tpu.memory_space<vmem>>, vector<32x32xbf16>
    %cst_14 = arith.constant dense<0.000000e+00> : vector<8x32xf32>
    %18 = tpu.matmul %16, %17, %cst_14 {dimension_numbers = #tpu.dot_dimension_numbers<[1], [0], [0], [1], [0, 0, 1, 1], [], []>} : vector<8x32xbf16>, vector<32x32xbf16>, vector<8x32xf32> -> vector<8x32xf32>
    %c0_15 = arith.constant 0 : index
    %c0_16 = arith.constant 0 : index
    %19 = vector.load %arg7[%c0_15, %c0_16] : memref<1x32xf32, #tpu.memory_space<vmem>>, vector<1x32xf32>
    %20 = vector.broadcast %19 : vector<1x32xf32> to vector<8x32xf32>
    %21 = arith.addf %18, %20 : vector<8x32xf32>
    %cst_17 = arith.constant 0.000000e+00 : f32
    %22 = vector.broadcast %cst_17 : f32 to vector<8x32xf32>
    %23 = arith.maximumf %21, %22 : vector<8x32xf32>
    %24 = arith.truncf %23 : vector<8x32xf32> to vector<8x32xbf16>
    %c0_18 = arith.constant 0 : index
    %c0_19 = arith.constant 0 : index
    %25 = vector.load %arg8[%c0_18, %c0_19] : memref<32x128xbf16, #tpu.memory_space<vmem>>, vector<32x128xbf16>
    %cst_20 = arith.constant dense<0.000000e+00> : vector<8x128xf32>
    %26 = tpu.matmul %24, %25, %cst_20 {dimension_numbers = #tpu.dot_dimension_numbers<[1], [0], [0], [1], [0, 0, 1, 1], [], []>} : vector<8x32xbf16>, vector<32x128xbf16>, vector<8x128xf32> -> vector<8x128xf32>
    %c0_21 = arith.constant 0 : index
    %c0_22 = arith.constant 0 : index
    %27 = vector.load %arg9[%c0_21, %c0_22] : memref<1x128xf32, #tpu.memory_space<vmem>>, vector<1x128xf32>
    %28 = vector.broadcast %27 : vector<1x128xf32> to vector<8x128xf32>
    %29 = arith.addf %26, %28 : vector<8x128xf32>
    %c0_23 = arith.constant 0 : index
    %c0_24 = arith.constant 0 : index
    %30 = vector.load %arg10[%c0_23, %c0_24] : memref<8x128xf32, #tpu.memory_space<vmem>>, vector<8x128xf32>
    tpu.vector_store %arg10[%c0_23, %c0_24], %29 {strides = array<i32>} : memref<8x128xf32, #tpu.memory_space<vmem>>, vector<8x128xf32>,
    return
  }
  func.func @transform_0(%arg0: i32) -> (i32, i32) {
    %c0_i32 = arith.constant 0 : i32
    %c0_i32_0 = arith.constant 0 : i32
    return %arg0, %c0_i32 : i32, i32
  }
  func.func @transform_1(%arg0: i32) -> (i32, i32) {
    %c0_i32 = arith.constant 0 : i32
    %c0_i32_0 = arith.constant 0 : i32
    %c0_i32_1 = arith.constant 0 : i32
    return %c0_i32, %c0_i32_0 : i32, i32
  }
  func.func @transform_2(%arg0: i32) -> (i32, i32) {
    %c0_i32 = arith.constant 0 : i32
    %c0_i32_0 = arith.constant 0 : i32
    %c0_i32_1 = arith.constant 0 : i32
    return %c0_i32, %c0_i32_0 : i32, i32
  }
  func.func @transform_3(%arg0: i32) -> (i32, i32) {
    %c0_i32 = arith.constant 0 : i32
    %c0_i32_0 = arith.constant 0 : i32
    %c0_i32_1 = arith.constant 0 : i32
    return %c0_i32, %c0_i32_0 : i32, i32
  }
  func.func @transform_4(%arg0: i32) -> (i32, i32) {
    %c0_i32 = arith.constant 0 : i32
    %c0_i32_0 = arith.constant 0 : i32
    %c0_i32_1 = arith.constant 0 : i32
    return %c0_i32, %c0_i32_0 : i32, i32
  }
  func.func @transform_5(%arg0: i32) -> (i32, i32) {
    %c0_i32 = arith.constant 0 : i32
    %c0_i32_0 = arith.constant 0 : i32
    %c0_i32_1 = arith.constant 0 : i32
    return %c0_i32, %c0_i32_0 : i32, i32
  }
  func.func @transform_6(%arg0: i32) -> (i32, i32) {
    %c0_i32 = arith.constant 0 : i32
    %c0_i32_0 = arith.constant 0 : i32
    %c0_i32_1 = arith.constant 0 : i32
    return %c0_i32, %c0_i32_0 : i32, i32
  }
  func.func @transform_7(%arg0: i32) -> (i32, i32) {
    %c0_i32 = arith.constant 0 : i32
    %c0_i32_0 = arith.constant 0 : i32
    %c0_i32_1 = arith.constant 0 : i32
    return %c0_i32, %c0_i32_0 : i32, i32
  }
  func.func @transform_8(%arg0: i32) -> (i32, i32) {
    %c0_i32 = arith.constant 0 : i32
    %c0_i32_0 = arith.constant 0 : i32
    %c0_i32_1 = arith.constant 0 : i32
    return %c0_i32, %c0_i32_0 : i32, i32
  }
  func.func @transform_9(%arg0: i32) -> (i32, i32) {
    %c0_i32 = arith.constant 0 : i32
    %c0_i32_0 = arith.constant 0 : i32
    return %arg0, %c0_i32 : i32, i32
  }
}

</mosaic_0001>

<bundles_post_ra>
// kernel: tpu_custom_call.1
= control target key start
LH: loop header
LB: loop body
LE: loop exit
PB: predicated region body
PF: predicated region fallthrough
CT: control target
= control target key end

     0   :  { %s1296_s0 = inlined_call_operand.vmem [shape: bf16[8,768], index: 0, kind: input, shape index: {}]   ;;  %s1297_s1 = inlined_call_operand.vmem [shape: bf16[768,32], index: 1, kind: input, shape index: {}]   ;;  %s1298_s2 = inlined_call_operand.vmem [shape: f32[1,32], index: 2, kind: input, shape index: {}]   ;;  %s1299_s3 = inlined_call_operand.vmem [shape: bf16[32,32], index: 3, kind: input, shape index: {}]   ;;  %s1300_s4 = inlined_call_operand.vmem [shape: f32[1,32], index: 4, kind: input, shape index: {}]   ;;  %s1301_s5 = inlined_call_operand.vmem [shape: bf16[32,32], index: 5, kind: input, shape index: {}]   ;;  %s1302_s6 = inlined_call_operand.vmem [shape: f32[1,32], index: 6, kind: input, shape index: {}]   ;;  %s1303_s7 = inlined_call_operand.vmem [shape: bf16[32,128], index: 7, kind: input, shape index: {}]   ;;  %s1304_s8 = inlined_call_operand.vmem [shape: f32[1,128], index: 8, kind: input, shape index: {}]   ;;  %s1305_s9 = inlined_call_operand.hbm [shape: f32[8,128], index: 9, kind: output, shape index: {}]  }
   0x1   :  { %v958_v0 = vld [vmem:[%s1297_s1 + $0x40] sm:$0xff]   ;;  %v962_v4 = vld [vmem:[%s1297_s1 + $0x48] sm:$0xff]   ;;  %v966_v8 = vld [vmem:[%s1297_s1 + $0x50] sm:$0xff]  }
   0x2   :  { %v959_v1 = vld [vmem:[%s1297_s1] sm:$0xff]   ;;  %856 = vmatprep.subr.bf16.mxu0 %v958_v0  ;;  %v963_v5 = vld [vmem:[%s1297_s1 + $0x8] sm:$0xff]   ;;  %v967_v9 = vld [vmem:[%s1297_s1 + $0x10] sm:$0xff]  }
   0x3   :  { %v960_v2 = vld [vmem:[%s1297_s1 + $0xc0] sm:$0xff]   ;;  %857 = vmatpush3.bf16.msra.mxu0 %v959_v1  ;;  %v964_v6 = vld [vmem:[%s1297_s1 + $0xc8] sm:$0xff]   ;;  %v968_v10 = vld [vmem:[%s1297_s1 + $0xd0] sm:$0xff]  }
   0x4   :  { %v961_v3 = vld [vmem:[%s1297_s1 + $0x80] sm:$0xff]   ;;  %878 = vmatprep.subr.bf16.mxu1 %v960_v2  ;;  %858 = vmatprep.subr.bf16.mxu0 %v962_v4  ;;  %v965_v7 = vld [vmem:[%s1297_s1 + $0x88] sm:$0xff]   ;;  %v969_v11 = vld [vmem:[%s1297_s1 + $0x90] sm:$0xff]  }
   0x5   :  { %879 = vmatpush3.bf16.msra.mxu1 %v961_v3  ;;  %v970_v12 = vld [vmem:[%s1297_s1 + $0x58] sm:$0xff]   ;;  %v974_v16 = vld [vmem:[%s1297_s1 + $0x60] sm:$0xff]   ;;  %v978_v20 = vld [vmem:[%s1297_s1 + $0x68] sm:$0xff]  }
   0x6   :  { %880 = vmatprep.subr.bf16.mxu1 %v964_v6  ;;  %v971_v13 = vld [vmem:[%s1297_s1 + $0x18] sm:$0xff]   ;;  %v975_v17 = vld [vmem:[%s1297_s1 + $0x20] sm:$0xff]   ;;  %v979_v21 = vld [vmem:[%s1297_s1 + $0x28] sm:$0xff]  }
   0x7   :  { %859 = vmatpush3.bf16.msra.mxu0 %v963_v5  ;;  %v972_v14 = vld [vmem:[%s1297_s1 + $0xd8] sm:$0xff]   ;;  %v976_v18 = vld [vmem:[%s1297_s1 + $0xe0] sm:$0xff]   ;;  %v980_v22 = vld [vmem:[%s1297_s1 + $0xe8] sm:$0xff]  }
   0x8   :  { %860 = vmatprep.subr.bf16.mxu0 %v966_v8  ;;  %v973_v15 = vld [vmem:[%s1297_s1 + $0x98] sm:$0xff]   ;;  %v977_v19 = vld [vmem:[%s1297_s1 + $0xa0] sm:$0xff]   ;;  %v981_v23 = vld [vmem:[%s1297_s1 + $0xa8] sm:$0xff]  }
   0x9   :  { %881 = vmatpush3.bf16.msra.mxu1 %v965_v7  ;;  %v982_v24 = vld [vmem:[%s1297_s1 + $0x70] sm:$0xff]   ;;  %v986_v28 = vld [vmem:[%s1297_s1 + $0x78] sm:$0xff]   ;;  %v34_v31 = vld [vmem:[%s1296_s0] sm:$0xff] }
   0xa   :  { %882 = vmatprep.subr.bf16.mxu1 %v968_v10  ;;  %v983_v25 = vld [vmem:[%s1297_s1 + $0x30] sm:$0xff]   ;;  %v987_v29 = vld [vmem:[%s1297_s1 + $0x38] sm:$0xff]   ;;  %v790_v32 = vcombine.low %v34_v31, %v34_v31  ;;  %v791_v33 = vcombine.high %v34_v31, %v34_v31  ;;  %v992_v35 = vld [vmem:[%s1297_s1 + $0x140] sm:$0xff]  }
   0xb   :  { %861 = vmatpush3.bf16.msra.mxu0 %v967_v9  ;;  %v984_v26 = vld [vmem:[%s1297_s1 + $0xf0] sm:$0xff]   ;;  %v988_v30 = vld [vmem:[%s1297_s1 + $0xf8] sm:$0xff]   ;;  %v35_v36 = vld [vmem:[%s1296_s0 + $0x8] sm:$0xff] }
   0xc   :  { %862 = vmatprep.subr.bf16.mxu0 %v970_v12  ;;  %v985_v27 = vld [vmem:[%s1297_s1 + $0xb0] sm:$0xff]   ;;  %v991_v34 = vld [vmem:[%s1297_s1 + $0xb8] sm:$0xff]   ;;  %481 = vmatprep.mubr.bf16.mxu0 %v791_v33  ;;  %v792_v37 = vcombine.low %v35_v36, %v35_v36  ;;  %v793_v38 = vcombine.high %v35_v36, %v35_v36  ;;  %v995_v39 = vld [vmem:[%s1297_s1 + $0x100] sm:$0xff]  }
   0xd   :  { %883 = vmatpush3.bf16.msra.mxu1 %v969_v11  ;;  %v996_v40 = vld [vmem:[%s1297_s1 + $0x148] sm:$0xff]   ;;  %v998_v42 = vld [vmem:[%s1297_s1 + $0x150] sm:$0xff]   ;;  %v1000_v44 = vld [vmem:[%s1297_s1 + $0x158] sm:$0xff]  }
   0xe   :  { %884 = vmatprep.subr.bf16.mxu1 %v972_v14  ;;  %521 = vmatprep.mubr.bf16.mxu1 %v793_v38  ;;  %v997_v41 = vld [vmem:[%s1297_s1 + $0x108] sm:$0xff]   ;;  %v999_v43 = vld [vmem:[%s1297_s1 + $0x110] sm:$0xff]   ;;  %v1001_v45 = vld [vmem:[%s1297_s1 + $0x118] sm:$0xff]  }
   0xf   :  { %863 = vmatpush3.bf16.msra.mxu0 %v971_v13  ;;  %v1002_v46 = vld [vmem:[%s1297_s1 + $0x160] sm:$0xff]   ;;  %v1004_v48 = vld [vmem:[%s1297_s1 + $0x168] sm:$0xff]   ;;  %v36_v49 = vld [vmem:[%s1296_s0 + $0x10] sm:$0xff] }
  0x10   :  { %864 = vmatprep.subr.bf16.mxu0 %v974_v16  ;;  %v1003_v47 = vld [vmem:[%s1297_s1 + $0x120] sm:$0xff]   ;;  %v795_v50 = vcombine.high %v36_v49, %v36_v49  ;;  %v1005_v51 = vld [vmem:[%s1297_s1 + $0x128] sm:$0xff]   ;;  %v1006_v52 = vld [vmem:[%s1297_s1 + $0x170] sm:$0xff]  }
  0x11   :  { %885 = vmatpush3.bf16.msra.mxu1 %v973_v15 }
  0x12   :  { %886 = vmatprep.subr.bf16.mxu1 %v976_v18 }
  0x13   :  { %865 = vmatpush3.bf16.msra.mxu0 %v975_v17 }
  0x14   :  { %866 = vmatprep.subr.bf16.mxu0 %v978_v20 }
  0x15   :  { %887 = vmatpush3.bf16.msra.mxu1 %v977_v19 }
  0x16   :  { %888 = vmatprep.subr.bf16.mxu1 %v980_v22 }
  0x17   :  { %867 = vmatpush3.bf16.msra.mxu0 %v979_v21 }
  0x18   :  { %868 = vmatprep.subr.bf16.mxu0 %v982_v24 }
  0x19   :  { %889 = vmatpush3.bf16.msra.mxu1 %v981_v23 }
  0x1a   :  { %890 = vmatprep.subr.bf16.mxu1 %v984_v26 }
  0x1b   :  { %869 = vmatpush3.bf16.msra.mxu0 %v983_v25 }
  0x1c   :  { %870 = vmatprep.subr.bf16.mxu0 %v986_v28 }
  0x1d   :  { %891 = vmatpush3.bf16.msra.mxu1 %v985_v27 }
  0x1e   :  { %892 = vmatprep.subr.bf16.mxu1 %v988_v30 }
  0x1f   :  { %871 = vmatpush3.bf16.msra.mxu0 %v987_v29 }
  0x20   :  { %900 = vmatprep.subr.bf16.mxu0 %v992_v35 }
  0x21   :  { %893 = vmatpush3.bf16.msra.mxu1 %v991_v34 }
  0x22   :  { %482 = vmatmul.mubr.bf16.vlgmr.msra.gmra.mrb[0].mxu0 %v790_v32 }
  0x23   :  { %901 = vmatpush3.bf16.msra.mxu0 %v995_v39  ;;  %561 = vmatprep.mubr.bf16.mxu0 %v795_v50 }
  0x24   :  { %522 = vmatmul.mubr.bf16.vlgmr.msra.gmra.mrb[0].mxu1 %v792_v37  ;;  %902 = vmatprep.subr.bf16.mxu0 %v996_v40 }
  0x27   :  { %903 = vmatpush3.bf16.msra.mxu0 %v997_v41 }
  0x28   :  { %904 = vmatprep.subr.bf16.mxu0 %v998_v42 }
  0x2b   :  { %905 = vmatpush3.bf16.msra.mxu0 %v999_v43 }
  0x2c   :  { %906 = vmatprep.subr.bf16.mxu0 %v1000_v44 }
  0x2f   :  { %907 = vmatpush3.bf16.msra.mxu0 %v1001_v45 }
  0x30   :  { %908 = vmatprep.subr.bf16.mxu0 %v1002_v46 }
  0x33   :  { %909 = vmatpush3.bf16.msra.mxu0 %v1003_v47 }
  0x34   :  { %910 = vmatprep.subr.bf16.mxu0 %v1004_v48 }
  0x35   :  { %14 = vsyncpa [#allocation3], 0  ;;  %v1007_v53 = vld [vmem:[%s1297_s1 + $0x130] sm:$0xff]   ;;  %v1008_v54 = vld [vmem:[%s1297_s1 + $0x178] sm:$0xff]   ;;  %v794_v56 = vcombine.low %v36_v49, %v36_v49  ;;  %v1042_v58 = vmov 0.0   ;;  %vm1043_vm0 = vmmov 0  }
  0x36   :  { %v1009_v55 = vld [vmem:[%s1297_s1 + $0x138] sm:$0xff]   ;;  %v1012_v57 = vld [vmem:[%s1299_s3] sm:$0xff]   ;;  %931 = vmatprep.subr.bf16.mxu1 %v1042_v58  ;;  %v1013_v59 = vld [vmem:[%s1299_s3 + $0x8] sm:$0xff]   ;;  %935 = vmatprep.mubr.msk.bf16.mxu1 %vm1043_vm0, %v1042_v58  ;;  %vm594_vm1 = vcmask 261120   ;;  %s1044_s20 = smov [#allocation2]  }
  0x37   :  { %911 = vmatpush3.bf16.msra.mxu0 %v1005_v51  ;;  %932 = vmatpush3.bf16.msra.mxu1 %v1012_v57  ;;  %v789_v61 = vld [vmem:[%s1298_s2] ss:$0 sm:$0xff]  ;;  %v1015_v18 = vld [vmem:[%s1301_s5 + $0x8] sm:$0xff]  }
  0x38   :  { %912 = vmatprep.subr.bf16.mxu0 %v1006_v52  ;;  %933 = vmatprep.subr.bf16.mxu1 %v1042_v58  ;;  %v1014_v16 = vld [vmem:[%s1301_s5] sm:$0xff]   ;;  %v1017_v28 = vld [vmem:[%s1303_s7 + $0x8] sm:$0xff]  }
  0x39   :  { %v844_v19 = vld [vmem:[%s1300_s4] ss:$0 sm:$0xff] }
  0x3a   :  { %v1016_v26 = vld [vmem:[%s1303_s7] sm:$0xff]   ;;  %s781_s7 = sshll.u32 %s1044_s20, 4  ;;  %s782_s7 = int_to_ptr.vmem [resolvable:$true] %s781_s7 }
  0x3b   :  { %913 = vmatpush3.bf16.msra.mxu0 %v1007_v53  ;;  %934 = vmatpush3.bf16.msra.mxu1 %v1013_v59  ;;  %v848_v29 = vld [vmem:[%s1302_s6] ss:$0 sm:$0xff]  ;;  %s1018_s6 = scalar_lea.vmem %s782_s7, 128  ;;  %p1023_p1 = scmp.lt.s32.totalorder %s782_s7, %s782_s7 }
  0x3c   :  { %914 = vmatprep.subr.bf16.mxu0 %v1008_v54  ;;  %939 = vmatprep.subr.bf16.mxu1 %v1042_v58  ;;  %v852_v37 = vld [vmem:[%s1304_s8] ss:$0 sm:$0xff]  ;;  %p1019_p0 = scmp.ne.s32.totalorder %s782_s7, %s1018_s6  ;;  %p1024_p2 = scmp.lt.s32.totalorder %s1018_s6, %s1018_s6 }
  0x3e   :  { %p1025_p3 = por %p1024_p2, %p1023_p1 }
  0x3f   :  { %915 = vmatpush3.bf16.msra.mxu0 %v1009_v55 }
  0x40   :  { %p1026_p4 = pnand %p1025_p3, %p1019_p0 }
  0x42   :  { %562 = vmatmul.mubr.bf16.vlgmr.msra.gmra.mrb[4].mxu0 %v794_v56 }
  0xf5   :  { %v872_v60 = vpop.f32.mrb[0].mxu0 }
  0xf6   :  { %v873_v62 = vpop.f32.mrb[1].mxu0 }
  0xf7   :  { %v874_v63 = vadd.f32 %v873_v62, %v872_v60  ;;  %v875_v0 = vpop.f32.mrb[2].mxu0  ;;  %v894_v1 = vpop.f32.mrb[0].mxu1 }
  0xf8   :  { %v876_v2 = vpop.f32.mrb[3].mxu0  ;;  %v895_v3 = vpop.f32.mrb[1].mxu1 }
  0xf9   :  { %v484_v4 = vadd.f32 %v874_v63, %v789_v61  ;;  %v896_v5 = vadd.f32 %v895_v3, %v894_v1  ;;  %v897_v6 = vpop.f32.mrb[2].mxu1 }
  0xfa   :  { %v898_v7 = vpop.f32.mrb[3].mxu1 }
  0xfb   :  { %v524_v8 = vadd.f32 %v896_v5, %v484_v4 }
 0x115   :  { %v916_v9 = vpop.f32.mrb[4].mxu0 }
 0x116   :  { %v917_v10 = vpop.f32.mrb[5].mxu0 }
 0x117   :  { %v918_v11 = vadd.f32 %v917_v10, %v916_v9  ;;  %v919_v12 = vpop.f32.mrb[6].mxu0 }
 0x118   :  { %v920_v13 = vpop.f32.mrb[7].mxu0 }
 0x119   :  { %v564_v14 = vadd.f32 %v918_v11, %v524_v8 }
 0x11b   :  { %v569_v15 = vmax.f32 %v564_v14, 0.0 }
 0x11d   :  { %v570_v17 = vpack.c.bf16 %v569_v15, %v569_v15 }
 0x11f   :  { %936 = vmatmul.mubr.msk.bf16.vlgmr.msra.gmra.mrb[4].mxu1 %vm594_vm1, %v570_v17 }
 0x120   :  { %940 = vmatpush3.bf16.msra.mxu1 %v1014_v16  ;;  %943 = vmatprep.mubr.msk.bf16.mxu1 %vm1043_vm0, %v1042_v58 }
 0x121   :  { %941 = vmatprep.subr.bf16.mxu1 %v1042_v58 }
 0x124   :  { %942 = vmatpush3.bf16.msra.mxu1 %v1015_v18 }
 0x125   :  { %947 = vmatprep.subr.bf16.mxu1 %v1042_v58 }
 0x1f2   :  { %v632_v20 = vpop.f32.mrb[4].mxu1 }
 0x1f3   :  { %v633_v21 = vadd.f32 %v844_v19, %v632_v20  ;;  %v937_v22 = vpop.f32.mrb[5].mxu1 }
 0x1f4   :  { %v635_v23 = vpop.f32.mrb[6].mxu1 }
 0x1f5   :  { %v638_v24 = vmax.f32 %v633_v21, 0.0  ;;  %v938_v25 = vpop.f32.mrb[7].mxu1 }
 0x1f7   :  { %v639_v27 = vpack.c.bf16 %v638_v24, %v638_v24 }
 0x1f9   :  { %944 = vmatmul.mubr.msk.bf16.vlgmr.msra.gmra.mrb[8].mxu1 %vm594_vm1, %v639_v27 }
 0x1fa   :  { %948 = vmatpush3.bf16.msra.mxu1 %v1016_v26  ;;  %951 = vmatprep.mubr.msk.bf16.mxu1 %vm1043_vm0, %v1042_v58 }
 0x1fb   :  { %949 = vmatprep.subr.bf16.mxu1 %v1042_v58 }
 0x1fe   :  { %950 = vmatpush3.bf16.msra.mxu1 %v1017_v28 }
 0x2cc   :  { %v700_v30 = vpop.f32.mrb[8].mxu1 }
 0x2cd   :  { %v701_v31 = vadd.f32 %v848_v29, %v700_v30  ;;  %v945_v32 = vpop.f32.mrb[9].mxu1 }
 0x2ce   :  { %v703_v33 = vpop.f32.mrb[10].mxu1 }
 0x2cf   :  { %v706_v34 = vmax.f32 %v701_v31, 0.0  ;;  %v946_v35 = vpop.f32.mrb[11].mxu1 }
 0x2d1   :  { %v707_v36 = vpack.c.bf16 %v706_v34, %v706_v34 }
 0x2d3   :  { %952 = vmatmul.mubr.msk.bf16.vlgmr.msra.gmra.mrb[12].mxu1 %vm594_vm1, %v707_v36 }
 0x3a6   :  { %v768_v38 = vpop.f32.mrb[12].mxu1 }
 0x3a7   :  { %v769_v39 = vadd.f32 %v852_v37, %v768_v38  ;;  %v953_v40 = vpop.f32.mrb[13].mxu1 }
 0x3a8   :  { %v771_v41 = vpop.f32.mrb[14].mxu1 }
 0x3a9   :  { %774 = vst [vmem:[#allocation2] sm:$0xff] %v769_v39  ;;  %v954_v42 = vpop.f32.mrb[15].mxu1 }
 0x3aa   :  { %1029 = shalt.err (!%p1026_p4)
}
 0x3ab   :  { %s1030_s8 = scalar_lea.hbm %s1305_s9, 128 }
 0x3ac   :  { %p1031_p5 = scmp.ne.s32.totalorder %s1305_s9, %s1030_s8  ;;  %p1034_p6 = scmp.lt.u32.totalorder %s1030_s8, %s1305_s9 }
 0x3ae   :  { %p1036_p7 = pnand %p1034_p6, %p1031_p5 }
 0x3b0   :  { %1039 = shalt.err (!%p1036_p7)
}
 0x3b1   :  { %784 = dma.vmem_to_hbm [thread:$0]  %s782_s7, 128, %s1305_s9, [#allocation3]  }
 0x3b2   :  { %1040 = dma.done.wait [#allocation3], 128  }
 0x3b3   :  { %1041 = vsyncadd [#allocation3], 4294967168 }
 0x3b4   :  { %788 = vsyncpa [#allocation3], 1 }

</bundles_post_ra>
